<compile_context>
chip_gen: v5e
topology: v5e:2x2
jax: 0.10.0
libtpu: 0.0.40
codegen_flags: <defaults>
</compile_context>

<pallas_src>
import jax
import jax.numpy as jnp
from jax.experimental import pallas as pl
from jax.experimental.pallas import tpu as pltpu

LN_EPS = 1e-5
_LANE = 128
_MXU_MIN_C = 16          # route the channel mix through the MXU for C >= 16, C % 8 == 0


# ----------------------------------------------------------------------------
# Hardware-aware sizing helpers
# ----------------------------------------------------------------------------
def _tpu_vmem_bytes():
    try:
        return int(pltpu.get_tpu_info().vmem_capacity_bytes)
    except Exception:
        return 64 * 1024 * 1024  # conservative (v7x-sized) fallback


def _target_block_bytes(vmem_bytes):
    # The elementwise chain materializes several full-tile f32 temporaries per
    # step (double buffered), so keep the raw input block well under VMEM:
    # 128 MiB VMEM (v5e/v6e) -> 2 MiB blocks, 64 MiB (v7x per-TC) -> 1 MiB.
    return max(1 << 20, min(4 << 20, vmem_bytes // 64))


def _pick_row_tile(rows, c, lane, itemsize, target_bytes, batch):
    """Sublane-row tile for the (B, C, rows, lane) small-C view."""
    bytes_per_row = max(1, c * lane * itemsize)
    max_rows = max(8, (target_bytes // bytes_per_row) // 8 * 8)
    tr = rows if rows <= max_rows else max_rows
    # v7x has 2 TensorCores: make sure the grid has >= 2 steps to shard.
    if batch * pl.cdiv(rows, tr) < 2 and rows >= 16:
        tr = max(8, (rows // 2) // 8 * 8)
    return tr


def _pick_lane_tile(hw, c, itemsize, target_bytes, batch):
    """Lane tile for the (B, C, HW)-style views (MXU path / ragged fallback)."""
    bytes_per_col = max(1, c * itemsize)
    max_hw = max(_LANE, (target_bytes // bytes_per_col) // _LANE * _LANE)
    t = hw if hw <= max_hw else max_hw
    # Ensure >= 2 grid steps when possible (v7x megacore).
    if batch * pl.cdiv(hw, t) < 2 and hw >= 2 * _LANE:
        t = max(_LANE, (hw // 2) // _LANE * _LANE)
    return t


# ----------------------------------------------------------------------------
# In-kernel helpers
# ----------------------------------------------------------------------------
def _sigmoid_f32(z):
    # exp on the EUP; divide replaced by EUP approximate reciprocal (keeps the
    # VALU free) + one Newton step to restore ~f32 accuracy (2 VALU ops/elem).
    # Clamp so exp never overflows to inf (would otherwise NaN the Newton step);
    # sigmoid(-80) is already ~0 so semantics are unchanged.
    den = 1.0 + jnp.exp(-jnp.maximum(z, -80.0))
    r = pl.reciprocal(den, approx=True)
    return r * (2.0 - den * r)


# ----------------------------------------------------------------------------
# Small-C kernel: (1, C, R, L) blocks, VPU channel mix, SMEM scalar params
# ----------------------------------------------------------------------------
def _prenorm_att_vpu_kernel(x_ref, p_ref, o_ref):
    # x_ref: (1, C, R, L) block.  Channel axis is leading, so every (R, L) slab
    # is a fully-occupied vreg tile and LN stats are plain vreg-wise adds.
    # p_ref: SMEM f32[(C*C + C,)] = [W'^T flattened (row d, col c) | b'].
    C = x_ref.shape[1]
    inv_c = 1.0 / C

    x = [x_ref[0, c].astype(jnp.float32) for c in range(C)]     # C slabs (R, L)

    # Single-pass moments over channels.
    s1 = x[0]
    s2 = x[0] * x[0]
    for c in range(1, C):
        s1 = s1 + x[c]
        s2 = s2 + x[c] * x[c]
    mean = s1 * inv_c
    var = jnp.maximum(s2 * inv_c - mean * mean, 0.0)
    rstd = jax.lax.rsqrt(var + LN_EPS)
    xh = [(x[c] - mean) * rstd for c in range(C)]                # LN affine folded into W'/b'

    # Pointwise channel mix + sigmoid gate + residual gating, one output channel
    # at a time.  Coefficients are SMEM scalars -> free scalar*vreg splats.
    # NOTE: ragged last blocks may contain garbage in padded rows; results there
    # are confined to those rows and discarded at writeback.
    for d in range(C):
        z = jnp.full(xh[0].shape, p_ref[C * C + d], dtype=jnp.float32)
        for c in range(C):
            z = z + p_ref[d * C + c] * xh[c]
        att = _sigmoid_f32(z)
        o_ref[0, d] = ((att + 1.0) * x[d]).astype(o_ref.dtype)


# ----------------------------------------------------------------------------
# Large-C kernel: (1, C, T) blocks, MXU channel mix
# ----------------------------------------------------------------------------
def _prenorm_att_mxu_kernel(x_ref, wt_ref, b_ref, o_ref):
    # x_ref: (1, C, T);  wt_ref: (C, C) = W'^T lane-aligned;  b_ref: (C, 1) = b'.
    x = x_ref[0].astype(jnp.float32)                             # (C, T)
    C = x.shape[0]
    inv_c = 1.0 / C

    # Single-pass moments over channels (sublane axis).
    mean = jnp.sum(x, axis=0, keepdims=True) * inv_c             # (1, T)
    ex2 = jnp.sum(x * x, axis=0, keepdims=True) * inv_c
    var = jnp.maximum(ex2 - mean * mean, 0.0)
    xhat = (x - mean) * jax.lax.rsqrt(var + LN_EPS)              # (C, T)

    z = jnp.dot(wt_ref[...].astype(jnp.float32), xhat,
                preferred_element_type=jnp.float32)              # MXU
    z = z + b_ref[...].astype(jnp.float32)                       # (C,1) lane-broadcast
    att = _sigmoid_f32(z)
    o_ref[0] = ((att + 1.0) * x).astype(o_ref.dtype)


# ----------------------------------------------------------------------------
# Wrapper
# ----------------------------------------------------------------------------
def prenorm_residual_att(x_nchw, gamma, beta, w, b):
    """x_nchw: (B, C, H, W); gamma/beta/b: (C,); w: (C_in, C_out). Returns (B, C, H, W)."""
    B, C, H, W = x_nchw.shape
    HW = H * W
    itemsize = x_nchw.dtype.itemsize

    # Fold the LayerNorm affine into the pointwise mix:
    #   att = sigmoid(W'^T @ xhat + b'),  W'[c,d] = gamma[c]*w[c,d],
    #   b'[d] = b[d] + sum_c beta[c]*w[c,d].
    gamma32 = gamma.astype(jnp.float32)
    beta32 = beta.astype(jnp.float32)
    w32 = w.astype(jnp.float32)
    b32 = b.astype(jnp.float32)
    wt_prime = jnp.transpose(w32 * gamma32[:, None])             # (C_out, C_in)
    b_prime = b32 + beta32 @ w32                                  # (C_out,)

    vmem_bytes = _tpu_vmem_bytes()
    target_bytes = _target_block_bytes(vmem_bytes)
    vmem_limit = int(min(vmem_bytes // 2, 64 * 1024 * 1024))

    use_mxu = (C >= _MXU_MIN_C) and (C % 8 == 0)

    if use_mxu:
        # ---- MXU path: (B, C, HW) view, W'^T as its own lane-aligned input ----
        x3 = x_nchw.reshape(B, C, HW)                            # free view
        tile_hw = _pick_lane_tile(HW, C, itemsize, target_bytes, B)
        grid = (B, pl.cdiv(HW, tile_hw))

        out3 = pl.pallas_call(
            _prenorm_att_mxu_kernel,
            out_shape=jax.ShapeDtypeStruct((B, C, HW), x_nchw.dtype),
            grid_spec=pltpu.PrefetchScalarGridSpec(
                num_scalar_prefetch=0,
                grid=grid,
                in_specs=[
                    pl.BlockSpec((1, C, tile_hw), lambda bi, hi: (bi, 0, hi)),
                    pl.BlockSpec((C, C), lambda bi, hi: (0, 0)),   # W'^T, fetched once
                    pl.BlockSpec((C, 1), lambda bi, hi: (0, 0)),   # b'
                ],
                out_specs=pl.BlockSpec((1, C, tile_hw), lambda bi, hi: (bi, 0, hi)),
            ),
            compiler_params=pltpu.CompilerParams(
                dimension_semantics=("parallel", "parallel"),
                vmem_limit_bytes=vmem_limit,
            ),
        )(x3, wt_prime, b_prime.reshape(C, 1))
        return out3.reshape(B, C, H, W)

    # ---- small-C path: (B, C, R, L) view, VPU mix, SMEM scalar params ----
    if HW % _LANE == 0:
        R, L = HW // _LANE, _LANE
        tr = _pick_row_tile(R, C, L, itemsize, target_bytes, B)
        tl = L
    else:
        # Ragged spatial extent: keep lane-dense layout, tile the lane axis.
        R, L = 1, HW
        tr = 1
        tl = _pick_lane_tile(L, C, itemsize, target_bytes, B)

    x4 = x_nchw.reshape(B, C, R, L)                              # free view
    params = jnp.concatenate(
        [wt_prime.reshape(-1), b_prime], axis=0
    ).astype(jnp.float32)                                        # (C*C + C,), -> SMEM

    grid = (B, pl.cdiv(R, tr), pl.cdiv(L, tl))

    out4 = pl.pallas_call(
        _prenorm_att_vpu_kernel,
        out_shape=jax.ShapeDtypeStruct((B, C, R, L), x_nchw.dtype),
        grid_spec=pltpu.PrefetchScalarGridSpec(
            num_scalar_prefetch=0,
            grid=grid,
            in_specs=[
                pl.BlockSpec((1, C, tr, tl), lambda bi, ri, li: (bi, 0, ri, li)),
                pl.BlockSpec(memory_space=pltpu.MemorySpace.SMEM),   # scalar params
            ],
            out_specs=pl.BlockSpec((1, C, tr, tl), lambda bi, ri, li: (bi, 0, ri, li)),
        ),
        compiler_params=pltpu.CompilerParams(
            dimension_semantics=("parallel", "parallel", "parallel"),
            vmem_limit_bytes=vmem_limit,
        ),
    )(x4, params)
    return out4.reshape(B, C, H, W)


# ----------------------------------------------------------------------------
# Pure-JAX reference (mirrors the PyTorch module)
# ----------------------------------------------------------------------------
def _reference(x_nchw, gamma, beta, w, b):
    x = jnp.transpose(x_nchw, (0, 2, 3, 1)).astype(jnp.float32)  # NHWC
    mean = jnp.mean(x, axis=-1, keepdims=True)
    var = jnp.mean((x - mean) ** 2, axis=-1, keepdims=True)
    xn = (x - mean) / jnp.sqrt(var + LN_EPS) * gamma + beta
    att = jax.nn.sigmoid(jnp.einsum("bhwc,cd->bhwd", xn,
                                    w.astype(jnp.float32)) + b.astype(jnp.float32))
    out = (att + 1.0) * x
    return jnp.transpose(out, (0, 3, 1, 2)).astype(x_nchw.dtype)


def _run_case(key, B, C, H, W, dtype, atol, rtol, name):
    k_x, k_w, k_b, k_g, k_be = jax.random.split(key, 5)
    x = jax.random.normal(k_x, (B, C, H, W), dtype=jnp.float32).astype(dtype)
    # Non-trivial LN affine params so the gamma/beta fold is actually exercised.
    gamma = 1.0 + 0.2 * jax.random.normal(k_g, (C,), dtype=jnp.float32)
    beta = 0.3 * jax.random.normal(k_be, (C,), dtype=jnp.float32)
    w = jax.random.normal(k_w, (C, C), dtype=jnp.float32) * (0.5 / jnp.sqrt(C))
    b = jax.random.normal(k_b, (C,), dtype=jnp.float32) * 0.1

    out = jax.block_until_ready(prenorm_residual_att(x, gamma, beta, w, b))
    ref = _reference(x, gamma, beta, w, b)

    assert out.shape == x.shape and out.dtype == x.dtype, name
    ok = jnp.allclose(out.astype(jnp.float32), ref.astype(jnp.float32),
                      atol=atol, rtol=rtol)
    assert bool(ok), f"mismatch vs reference in case {name}"


if __name__ == "__main__":
    key = jax.random.PRNGKey(0)
    k1, k2, k3 = jax.random.split(key, 3)

    # Main case: small C -> VPU path with full-occupancy (R, 128) slabs.
    _run_case(k1, B=2, C=4, H=16, W=16, dtype=jnp.float32,
              atol=1e-3, rtol=1e-3, name="C=4 f32 (VPU path)")
    # Large C -> MXU path with lane-aligned W'^T and >= 2 grid steps.
    _run_case(k2, B=1, C=64, H=16, W=16, dtype=jnp.float32,
              atol=5e-3, rtol=5e-3, name="C=64 f32 (MXU path)")
    # bf16 inputs through the small-C path.
    _run_case(k3, B=2, C=4, H=16, W=16, dtype=jnp.bfloat16,
              atol=2e-2, rtol=2e-2, name="C=4 bf16 (VPU path)")

    print("KERNEL_OK")
</pallas_src>

<mosaic_0001>
module attributes {stable_mosaic.version = 11 : i64} {
  func.func @_prenorm_att_vpu_kernel(%arg0: i32, %arg1: i32, %arg2: i32, %arg3: memref<1x4x2x128xf32, #tpu.memory_space<vmem>>, %arg4: memref<20xf32, #tpu.memory_space<smem>>, %arg5: memref<1x4x2x128xf32, #tpu.memory_space<vmem>>) attributes {dimension_semantics = [#tpu.dimension_semantics<parallel>, #tpu.dimension_semantics<parallel>, #tpu.dimension_semantics<parallel>], iteration_bounds = array<i64: 2, 1, 1>, scalar_prefetch = 0 : i64, scratch_operands = 0 : i64, tpu.core_type = #tpu.core_type<tc>, window_params = [{transform_indices = @transform_0, window_bounds = array<i64: 1, 4, 2, 128>}, {transform_indices = @transform_1, window_bounds = array<i64: 20>}, {transform_indices = @transform_2, window_bounds = array<i64: 1, 4, 2, 128>}]} {
    %c0 = arith.constant 0 : index
    %c0_0 = arith.constant 0 : index
    %c0_1 = arith.constant 0 : index
    %c0_2 = arith.constant 0 : index
    %0 = vector.load %arg3[%c0, %c0_0, %c0_1, %c0_2] : memref<1x4x2x128xf32, #tpu.memory_space<vmem>>, vector<1x1x2x128xf32>
    %1 = vector.shape_cast %0 : vector<1x1x2x128xf32> to vector<2x128xf32>
    %c0_3 = arith.constant 0 : index
    %c1 = arith.constant 1 : index
    %c0_4 = arith.constant 0 : index
    %c0_5 = arith.constant 0 : index
    %2 = vector.load %arg3[%c0_3, %c1, %c0_4, %c0_5] : memref<1x4x2x128xf32, #tpu.memory_space<vmem>>, vector<1x1x2x128xf32>
    %3 = vector.shape_cast %2 : vector<1x1x2x128xf32> to vector<2x128xf32>
    %c0_6 = arith.constant 0 : index
    %c2 = arith.constant 2 : index
    %c0_7 = arith.constant 0 : index
    %c0_8 = arith.constant 0 : index
    %4 = vector.load %arg3[%c0_6, %c2, %c0_7, %c0_8] : memref<1x4x2x128xf32, #tpu.memory_space<vmem>>, vector<1x1x2x128xf32>
    %5 = vector.shape_cast %4 : vector<1x1x2x128xf32> to vector<2x128xf32>
    %c0_9 = arith.constant 0 : index
    %c3 = arith.constant 3 : index
    %c0_10 = arith.constant 0 : index
    %c0_11 = arith.constant 0 : index
    %6 = vector.load %arg3[%c0_9, %c3, %c0_10, %c0_11] : memref<1x4x2x128xf32, #tpu.memory_space<vmem>>, vector<1x1x2x128xf32>
    %7 = vector.shape_cast %6 : vector<1x1x2x128xf32> to vector<2x128xf32>
    %8 = arith.mulf %1, %1 : vector<2x128xf32>
    %9 = arith.addf %1, %3 : vector<2x128xf32>
    %10 = arith.mulf %3, %3 : vector<2x128xf32>
    %11 = arith.addf %8, %10 : vector<2x128xf32>
    %12 = arith.addf %9, %5 : vector<2x128xf32>
    %13 = arith.mulf %5, %5 : vector<2x128xf32>
    %14 = arith.addf %11, %13 : vector<2x128xf32>
    %15 = arith.addf %12, %7 : vector<2x128xf32>
    %16 = arith.mulf %7, %7 : vector<2x128xf32>
    %17 = arith.addf %14, %16 : vector<2x128xf32>
    %cst = arith.constant 2.500000e-01 : f32
    %18 = vector.broadcast %cst : f32 to vector<2x128xf32>
    %19 = arith.mulf %15, %18 : vector<2x128xf32>
    %cst_12 = arith.constant 2.500000e-01 : f32
    %20 = vector.broadcast %cst_12 : f32 to vector<2x128xf32>
    %21 = arith.mulf %17, %20 : vector<2x128xf32>
    %22 = arith.mulf %19, %19 : vector<2x128xf32>
    %23 = arith.subf %21, %22 : vector<2x128xf32>
    %cst_13 = arith.constant 0.000000e+00 : f32
    %24 = vector.broadcast %cst_13 : f32 to vector<2x128xf32>
    %25 = arith.maximumf %23, %24 : vector<2x128xf32>
    %cst_14 = arith.constant 9.99999974E-6 : f32
    %26 = vector.broadcast %cst_14 : f32 to vector<2x128xf32>
    %27 = arith.addf %25, %26 : vector<2x128xf32>
    %28 = math.rsqrt %27 : vector<2x128xf32>
    %29 = arith.subf %1, %19 : vector<2x128xf32>
    %30 = arith.mulf %29, %28 : vector<2x128xf32>
    %31 = arith.subf %3, %19 : vector<2x128xf32>
    %32 = arith.mulf %31, %28 : vector<2x128xf32>
    %33 = arith.subf %5, %19 : vector<2x128xf32>
    %34 = arith.mulf %33, %28 : vector<2x128xf32>
    %35 = arith.subf %7, %19 : vector<2x128xf32>
    %36 = arith.mulf %35, %28 : vector<2x128xf32>
    %c16 = arith.constant 16 : index
    %37 = memref.load %arg4[%c16] : memref<20xf32, #tpu.memory_space<smem>>
    %38 = vector.broadcast %37 : f32 to vector<2x128xf32>
    %c0_15 = arith.constant 0 : index
    %39 = memref.load %arg4[%c0_15] : memref<20xf32, #tpu.memory_space<smem>>
    %40 = vector.broadcast %39 : f32 to vector<2x128xf32>
    %41 = arith.mulf %40, %30 : vector<2x128xf32>
    %42 = arith.addf %38, %41 : vector<2x128xf32>
    %c1_16 = arith.constant 1 : index
    %43 = memref.load %arg4[%c1_16] : memref<20xf32, #tpu.memory_space<smem>>
    %44 = vector.broadcast %43 : f32 to vector<2x128xf32>
    %45 = arith.mulf %44, %32 : vector<2x128xf32>
    %46 = arith.addf %42, %45 : vector<2x128xf32>
    %c2_17 = arith.constant 2 : index
    %47 = memref.load %arg4[%c2_17] : memref<20xf32, #tpu.memory_space<smem>>
    %48 = vector.broadcast %47 : f32 to vector<2x128xf32>
    %49 = arith.mulf %48, %34 : vector<2x128xf32>
    %50 = arith.addf %46, %49 : vector<2x128xf32>
    %c3_18 = arith.constant 3 : index
    %51 = memref.load %arg4[%c3_18] : memref<20xf32, #tpu.memory_space<smem>>
    %52 = vector.broadcast %51 : f32 to vector<2x128xf32>
    %53 = arith.mulf %52, %36 : vector<2x128xf32>
    %54 = arith.addf %50, %53 : vector<2x128xf32>
    %cst_19 = arith.constant -8.000000e+01 : f32
    %55 = vector.broadcast %cst_19 : f32 to vector<2x128xf32>
    %56 = arith.maximumf %54, %55 : vector<2x128xf32>
    %cst_20 = arith.constant 0.000000e+00 : f32
    %57 = vector.broadcast %cst_20 : f32 to vector<2x128xf32>
    %58 = arith.subf %57, %56 : vector<2x128xf32>
    %59 = math.exp %58 : vector<2x128xf32>
    %cst_21 = arith.constant 1.000000e+00 : f32
    %60 = vector.broadcast %cst_21 : f32 to vector<2x128xf32>
    %61 = arith.addf %60, %59 : vector<2x128xf32>
    %62 = tpu.reciprocal %61 {approx = true} : vector<2x128xf32> -> vector<2x128xf32>
    %63 = arith.mulf %61, %62 : vector<2x128xf32>
    %cst_22 = arith.constant 2.000000e+00 : f32
    %64 = vector.broadcast %cst_22 : f32 to vector<2x128xf32>
    %65 = arith.subf %64, %63 : vector<2x128xf32>
    %66 = arith.mulf %62, %65 : vector<2x128xf32>
    %cst_23 = arith.constant 1.000000e+00 : f32
    %67 = vector.broadcast %cst_23 : f32 to vector<2x128xf32>
    %68 = arith.addf %66, %67 : vector<2x128xf32>
    %69 = arith.mulf %68, %1 : vector<2x128xf32>
    %c0_24 = arith.constant 0 : index
    %c0_25 = arith.constant 0 : index
    %c0_26 = arith.constant 0 : index
    %c0_27 = arith.constant 0 : index
    %70 = vector.load %arg5[%c0_24, %c0_25, %c0_26, %c0_27] : memref<1x4x2x128xf32, #tpu.memory_space<vmem>>, vector<1x1x2x128xf32>
    %71 = vector.shape_cast %70 : vector<1x1x2x128xf32> to vector<2x128xf32>
    %72 = vector.shape_cast %69 : vector<2x128xf32> to vector<1x1x2x128xf32>
    tpu.vector_store %arg5[%c0_24, %c0_25, %c0_26, %c0_27], %72 {strides = array<i32>} : memref<1x4x2x128xf32, #tpu.memory_space<vmem>>, vector<1x1x2x128xf32>,
    %c17 = arith.constant 17 : index
    %73 = memref.load %arg4[%c17] : memref<20xf32, #tpu.memory_space<smem>>
    %74 = vector.broadcast %73 : f32 to vector<2x128xf32>
    %c4 = arith.constant 4 : index
    %75 = memref.load %arg4[%c4] : memref<20xf32, #tpu.memory_space<smem>>
    %76 = vector.broadcast %75 : f32 to vector<2x128xf32>
    %77 = arith.mulf %76, %30 : vector<2x128xf32>
    %78 = arith.addf %74, %77 : vector<2x128xf32>
    %c5 = arith.constant 5 : index
    %79 = memref.load %arg4[%c5] : memref<20xf32, #tpu.memory_space<smem>>
    %80 = vector.broadcast %79 : f32 to vector<2x128xf32>
    %81 = arith.mulf %80, %32 : vector<2x128xf32>
    %82 = arith.addf %78, %81 : vector<2x128xf32>
    %c6 = arith.constant 6 : index
    %83 = memref.load %arg4[%c6] : memref<20xf32, #tpu.memory_space<smem>>
    %84 = vector.broadcast %83 : f32 to vector<2x128xf32>
    %85 = arith.mulf %84, %34 : vector<2x128xf32>
    %86 = arith.addf %82, %85 : vector<2x128xf32>
    %c7 = arith.constant 7 : index
    %87 = memref.load %arg4[%c7] : memref<20xf32, #tpu.memory_space<smem>>
    %88 = vector.broadcast %87 : f32 to vector<2x128xf32>
    %89 = arith.mulf %88, %36 : vector<2x128xf32>
    %90 = arith.addf %86, %89 : vector<2x128xf32>
    %cst_28 = arith.constant -8.000000e+01 : f32
    %91 = vector.broadcast %cst_28 : f32 to vector<2x128xf32>
    %92 = arith.maximumf %90, %91 : vector<2x128xf32>
    %cst_29 = arith.constant 0.000000e+00 : f32
    %93 = vector.broadcast %cst_29 : f32 to vector<2x128xf32>
    %94 = arith.subf %93, %92 : vector<2x128xf32>
    %95 = math.exp %94 : vector<2x128xf32>
    %cst_30 = arith.constant 1.000000e+00 : f32
    %96 = vector.broadcast %cst_30 : f32 to vector<2x128xf32>
    %97 = arith.addf %96, %95 : vector<2x128xf32>
    %98 = tpu.reciprocal %97 {approx = true} : vector<2x128xf32> -> vector<2x128xf32>
    %99 = arith.mulf %97, %98 : vector<2x128xf32>
    %cst_31 = arith.constant 2.000000e+00 : f32
    %100 = vector.broadcast %cst_31 : f32 to vector<2x128xf32>
    %101 = arith.subf %100, %99 : vector<2x128xf32>
    %102 = arith.mulf %98, %101 : vector<2x128xf32>
    %cst_32 = arith.constant 1.000000e+00 : f32
    %103 = vector.broadcast %cst_32 : f32 to vector<2x128xf32>
    %104 = arith.addf %102, %103 : vector<2x128xf32>
    %105 = arith.mulf %104, %3 : vector<2x128xf32>
    %c0_33 = arith.constant 0 : index
    %c1_34 = arith.constant 1 : index
    %c0_35 = arith.constant 0 : index
    %c0_36 = arith.constant 0 : index
    %106 = vector.load %arg5[%c0_33, %c1_34, %c0_35, %c0_36] : memref<1x4x2x128xf32, #tpu.memory_space<vmem>>, vector<1x1x2x128xf32>
    %107 = vector.shape_cast %106 : vector<1x1x2x128xf32> to vector<2x128xf32>
    %108 = vector.shape_cast %105 : vector<2x128xf32> to vector<1x1x2x128xf32>
    tpu.vector_store %arg5[%c0_33, %c1_34, %c0_35, %c0_36], %108 {strides = array<i32>} : memref<1x4x2x128xf32, #tpu.memory_space<vmem>>, vector<1x1x2x128xf32>,
    %c18 = arith.constant 18 : index
    %109 = memref.load %arg4[%c18] : memref<20xf32, #tpu.memory_space<smem>>
    %110 = vector.broadcast %109 : f32 to vector<2x128xf32>
    %c8 = arith.constant 8 : index
    %111 = memref.load %arg4[%c8] : memref<20xf32, #tpu.memory_space<smem>>
    %112 = vector.broadcast %111 : f32 to vector<2x128xf32>
    %113 = arith.mulf %112, %30 : vector<2x128xf32>
    %114 = arith.addf %110, %113 : vector<2x128xf32>
    %c9 = arith.constant 9 : index
    %115 = memref.load %arg4[%c9] : memref<20xf32, #tpu.memory_space<smem>>
    %116 = vector.broadcast %115 : f32 to vector<2x128xf32>
    %117 = arith.mulf %116, %32 : vector<2x128xf32>
    %118 = arith.addf %114, %117 : vector<2x128xf32>
    %c10 = arith.constant 10 : index
    %119 = memref.load %arg4[%c10] : memref<20xf32, #tpu.memory_space<smem>>
    %120 = vector.broadcast %119 : f32 to vector<2x128xf32>
    %121 = arith.mulf %120, %34 : vector<2x128xf32>
    %122 = arith.addf %118, %121 : vector<2x128xf32>
    %c11 = arith.constant 11 : index
    %123 = memref.load %arg4[%c11] : memref<20xf32, #tpu.memory_space<smem>>
    %124 = vector.broadcast %123 : f32 to vector<2x128xf32>
    %125 = arith.mulf %124, %36 : vector<2x128xf32>
    %126 = arith.addf %122, %125 : vector<2x128xf32>
    %cst_37 = arith.constant -8.000000e+01 : f32
    %127 = vector.broadcast %cst_37 : f32 to vector<2x128xf32>
    %128 = arith.maximumf %126, %127 : vector<2x128xf32>
    %cst_38 = arith.constant 0.000000e+00 : f32
    %129 = vector.broadcast %cst_38 : f32 to vector<2x128xf32>
    %130 = arith.subf %129, %128 : vector<2x128xf32>
    %131 = math.exp %130 : vector<2x128xf32>
    %cst_39 = arith.constant 1.000000e+00 : f32
    %132 = vector.broadcast %cst_39 : f32 to vector<2x128xf32>
    %133 = arith.addf %132, %131 : vector<2x128xf32>
    %134 = tpu.reciprocal %133 {approx = true} : vector<2x128xf32> -> vector<2x128xf32>
    %135 = arith.mulf %133, %134 : vector<2x128xf32>
    %cst_40 = arith.constant 2.000000e+00 : f32
    %136 = vector.broadcast %cst_40 : f32 to vector<2x128xf32>
    %137 = arith.subf %136, %135 : vector<2x128xf32>
    %138 = arith.mulf %134, %137 : vector<2x128xf32>
    %cst_41 = arith.constant 1.000000e+00 : f32
    %139 = vector.broadcast %cst_41 : f32 to vector<2x128xf32>
    %140 = arith.addf %138, %139 : vector<2x128xf32>
    %141 = arith.mulf %140, %5 : vector<2x128xf32>
    %c0_42 = arith.constant 0 : index
    %c2_43 = arith.constant 2 : index
    %c0_44 = arith.constant 0 : index
    %c0_45 = arith.constant 0 : index
    %142 = vector.load %arg5[%c0_42, %c2_43, %c0_44, %c0_45] : memref<1x4x2x128xf32, #tpu.memory_space<vmem>>, vector<1x1x2x128xf32>
    %143 = vector.shape_cast %142 : vector<1x1x2x128xf32> to vector<2x128xf32>
    %144 = vector.shape_cast %141 : vector<2x128xf32> to vector<1x1x2x128xf32>
    tpu.vector_store %arg5[%c0_42, %c2_43, %c0_44, %c0_45], %144 {strides = array<i32>} : memref<1x4x2x128xf32, #tpu.memory_space<vmem>>, vector<1x1x2x128xf32>,
    %c19 = arith.constant 19 : index
    %145 = memref.load %arg4[%c19] : memref<20xf32, #tpu.memory_space<smem>>
    %146 = vector.broadcast %145 : f32 to vector<2x128xf32>
    %c12 = arith.constant 12 : index
    %147 = memref.load %arg4[%c12] : memref<20xf32, #tpu.memory_space<smem>>
    %148 = vector.broadcast %147 : f32 to vector<2x128xf32>
    %149 = arith.mulf %148, %30 : vector<2x128xf32>
    %150 = arith.addf %146, %149 : vector<2x128xf32>
    %c13 = arith.constant 13 : index
    %151 = memref.load %arg4[%c13] : memref<20xf32, #tpu.memory_space<smem>>
    %152 = vector.broadcast %151 : f32 to vector<2x128xf32>
    %153 = arith.mulf %152, %32 : vector<2x128xf32>
    %154 = arith.addf %150, %153 : vector<2x128xf32>
    %c14 = arith.constant 14 : index
    %155 = memref.load %arg4[%c14] : memref<20xf32, #tpu.memory_space<smem>>
    %156 = vector.broadcast %155 : f32 to vector<2x128xf32>
    %157 = arith.mulf %156, %34 : vector<2x128xf32>
    %158 = arith.addf %154, %157 : vector<2x128xf32>
    %c15 = arith.constant 15 : index
    %159 = memref.load %arg4[%c15] : memref<20xf32, #tpu.memory_space<smem>>
    %160 = vector.broadcast %159 : f32 to vector<2x128xf32>
    %161 = arith.mulf %160, %36 : vector<2x128xf32>
    %162 = arith.addf %158, %161 : vector<2x128xf32>
    %cst_46 = arith.constant -8.000000e+01 : f32
    %163 = vector.broadcast %cst_46 : f32 to vector<2x128xf32>
    %164 = arith.maximumf %162, %163 : vector<2x128xf32>
    %cst_47 = arith.constant 0.000000e+00 : f32
    %165 = vector.broadcast %cst_47 : f32 to vector<2x128xf32>
    %166 = arith.subf %165, %164 : vector<2x128xf32>
    %167 = math.exp %166 : vector<2x128xf32>
    %cst_48 = arith.constant 1.000000e+00 : f32
    %168 = vector.broadcast %cst_48 : f32 to vector<2x128xf32>
    %169 = arith.addf %168, %167 : vector<2x128xf32>
    %170 = tpu.reciprocal %169 {approx = true} : vector<2x128xf32> -> vector<2x128xf32>
    %171 = arith.mulf %169, %170 : vector<2x128xf32>
    %cst_49 = arith.constant 2.000000e+00 : f32
    %172 = vector.broadcast %cst_49 : f32 to vector<2x128xf32>
    %173 = arith.subf %172, %171 : vector<2x128xf32>
    %174 = arith.mulf %170, %173 : vector<2x128xf32>
    %cst_50 = arith.constant 1.000000e+00 : f32
    %175 = vector.broadcast %cst_50 : f32 to vector<2x128xf32>
    %176 = arith.addf %174, %175 : vector<2x128xf32>
    %177 = arith.mulf %176, %7 : vector<2x128xf32>
    %c0_51 = arith.constant 0 : index
    %c3_52 = arith.constant 3 : index
    %c0_53 = arith.constant 0 : index
    %c0_54 = arith.constant 0 : index
    %178 = vector.load %arg5[%c0_51, %c3_52, %c0_53, %c0_54] : memref<1x4x2x128xf32, #tpu.memory_space<vmem>>, vector<1x1x2x128xf32>
    %179 = vector.shape_cast %178 : vector<1x1x2x128xf32> to vector<2x128xf32>
    %180 = vector.shape_cast %177 : vector<2x128xf32> to vector<1x1x2x128xf32>
    tpu.vector_store %arg5[%c0_51, %c3_52, %c0_53, %c0_54], %180 {strides = array<i32>} : memref<1x4x2x128xf32, #tpu.memory_space<vmem>>, vector<1x1x2x128xf32>,
    return
  }
  func.func @transform_0(%arg0: i32, %arg1: i32, %arg2: i32) -> (i32, i32, i32, i32) {
    %c0_i32 = arith.constant 0 : i32
    %c0_i32_0 = arith.constant 0 : i32
    return %arg0, %c0_i32, %arg1, %arg2 : i32, i32, i32, i32
  }
  func.func @transform_1(%arg0: i32, %arg1: i32, %arg2: i32) -> i32 {
    %c0_i32 = arith.constant 0 : i32
    %c0_i32_0 = arith.constant 0 : i32
    return %c0_i32 : i32
  }
  func.func @transform_2(%arg0: i32, %arg1: i32, %arg2: i32) -> (i32, i32, i32, i32) {
    %c0_i32 = arith.constant 0 : i32
    %c0_i32_0 = arith.constant 0 : i32
    return %arg0, %c0_i32, %arg1, %arg2 : i32, i32, i32, i32
  }
}

</mosaic_0001>

<bundles_post_ra>
// kernel: tpu_custom_call.1
= control target key start
LH: loop header
LB: loop body
LE: loop exit
PB: predicated region body
PF: predicated region fallthrough
CT: control target
= control target key end

     0   :  { %s1026_s0 = inlined_call_operand.hbm [shape: f32[2,4,2,128], index: 0, kind: input, shape index: {}]   ;;  %s1027_s1 = inlined_call_operand.hbm [shape: f32[20], index: 1, kind: input, shape index: {}]   ;;  %s1028_s2 = inlined_call_operand.hbm [shape: f32[2,4,2,128], index: 2, kind: output, shape index: {}]  }
   0x1   :  { %1031 = sst [smem:[#allocation12_spill]] %s1026_s0 }
   0x2   :  { %1032 = sst [smem:[#allocation13_spill]] %s1027_s1 }
   0x3   :  { %7 = vsyncpa [#allocation3], 0 }
   0x4   :  { %9 = vsyncpa [#allocation3 + $0x1], 0 }
   0x5   :  { %10 = vsyncpa [#allocation5], 0 }
   0x6   :  { %11 = vsyncpa [#allocation4], 0 }
   0x7   :  { %13 = vsyncpa [#allocation4 + $0x1], 0  ;;  %s783_s9 = smov 0   ;;  %s785_s10 = smov 0  }
   0x8   :  { %s787_s11 = smov 0   ;;  %s789_s12 = smov 0  }
   0x9   :  { %s791_s13 = smov 0   ;;  %s793_s14 = smov 0  }
   0xa LB: > { %s491_s15 = sadd.s32 4294967295, %s761_s14   ;;  %s492_s16 = sadd.s32 4294967294, %s761_s14   ;;  %s761_s14 = sphi %s793_s14, %s19_s14   ;;  %s757_s13 = sphi %s791_s13, %s1049_s13   ;;  %s753_s12 = sphi %s789_s12, %s1048_s12   ;;  %s749_s11 = sphi %s787_s11, %s1047_s11   ;;  %s745_s10 = sphi %s785_s10, %s1046_s10   ;;  %s741_s9 = sphi %s783_s9, %s1045_s9  }
   0xb   : > { %s49_s17 = sadd.s32 1, %s749_s11  ;;  %p56_p0 = scmp.ne.s32.totalorder %s749_s11, %s745_s10 }
   0xc   : > { %p57_p1 = scmp.eq.s32.totalorder %s761_s14, 0  ;;  %p62_p2 = scmp.ne.s32.totalorder %s745_s10, %s741_s9 }
   0xd   : > { %p821_p3 = scmp.eq.s32.totalorder %s491_s15, 0  ;;  %p111_p4 = scmp.eq.s32.totalorder %s491_s15, 1 }
   0xe   : > { %p825_p5 = por %p57_p1, %p56_p0  ;;  %p117_p6 = scmp.eq.s32.totalorder %s492_s16, 1 }
   0xf   : > { %p831_p7 = por %p821_p3, %p62_p2  ;;  %p835_p8 = por %p111_p4, %p56_p0 }
  0x10   : > { %p839_p9 = por %p117_p6, %p62_p2  ;;  %p493_p10 = scmp.ge.s32.totalorder %s761_s14, 1 }
  0x11   : > { %p124_p11 = scmp.lt.s32.totalorder %s761_s14, 3  ;;  %s1038_s1 = sld [smem:[#allocation13_spill]] }
  0x12   : > { %p495_p13 = scmp.ge.s32.totalorder %s761_s14, 2  ;;  %p556_p0 = scmp.lt.s32.totalorder %s761_s14, 2 }
  0x13   : > { %p848_p12 = pnand %p493_p10, %p124_p11  ;;  %s38_s28 = sadd.s32 1, %s757_s13 }
  0x14   : > { %p858_p2 = pnand %p556_p0, %p825_p5  ;;  %p40_p6 = scmp.ge.s32.totalorder %s38_s28, 2 }
  0x15   : > { %p543_p1 = pneg %p848_p12  ;;  %s147_s29 = sand.u32 1, %s749_s11  }
  0x16   : > { %s763_s30 = smov [#allocation6]   ;;  %s1051_s28 = smov (%p40_p6, %s38_s28), 0 }
  0x17   : > { %s136_s25 = sshll.u32 %s1038_s1, 4  ;;  %p544_p4 = pnand %p543_p1, %p821_p3  ;;  %s137_s25 = int_to_ptr.hbm [resolvable:$true] %s136_s25 }
  0x18   : > { %1041 = sst [smem:[#allocation11_spill]] %s1051_s28  ;;  %s496_s3 = sshll.u32 %s147_s29, 3 }
  0x19   : > { %546 = dma.hbm_to_smem (!%p544_p4), %s137_s25, 16, %s763_s30, [#allocation5]  }
  0x1a   : > { %s42_s4 = ssub.s32 %s757_s13, %s1051_s28  ;;  %s533_s5 = sshll.u32 %s757_s13, 3 }
  0x1b   : > { %p47_p10 = scmp.eq.s32.totalorder %s42_s4, 0  ;;  %s1042_s0 = sld [smem:[#allocation12_spill]] }
  0x1c   : > { %s151_s15 = scalar_lea.vmem [#allocation2], %s496_s3  ;;  %s148_s24 = scalar_lea.sflag [#allocation3], %s147_s29 }
  0x1d   : > { %s161_s16 = sshll.u32 %s151_s15, 4  ;;  %s764_s25 = smov 32   ;;  %s162_s16 = int_to_ptr.vmem [resolvable:$true] %s161_s16 }
  0x1e   : > { %s877_s19 = scalar_select %p47_p10, %s749_s11, %s49_s17  }
  0x1f   : > { %s765_s30 = smov 2   ;;  %173 = sbr.rel (%p848_p12) target bundleno = 128 (0x80), region = 28 }
  0x20   : > { %s884_s4 = sand.u32 (!%p848_p12), 1, %s745_s10  }
  0x21   : > { %s158_s8 = scalar_lea.hbm %s1042_s0, %s533_s5  ;;  %s1029_s17 = sshll.u32 (!%p848_p12), %s884_s4, 3 }
  0x22   : > { %s159_s23 = sshll.u32 %s158_s8, 4  ;;  %s176_s3 = scalar_lea.sflag (!%p848_p12), [#allocation3], %s884_s4  ;;  %s160_s23 = int_to_ptr.hbm [resolvable:$true] %s159_s23 }
  0x23   : > { %550 = dma.hbm_to_vmem [thread:$0]  (!%p858_p2), %s160_s23, 128, %s162_s16, %s148_s24, %s764_s25, %s764_s25, %s765_s30  }
  0x24   : > { %s179_s5 = scalar_lea.vmem [#allocation2], %s1029_s17 }
  0x25   : > { %728 = dma.done.wait (%p831_p7), %s176_s3, 128  }
  0x26   : > { %730 = vsyncadd (%p831_p7), %s176_s3, 4294967168 }
  0x27   : > { %732 = dma.done.wait (%p821_p3), [#allocation5], 16  }
  0x28   : > { %734 = vsyncadd (%p821_p3), [#allocation5], 4294967280 }
  0x29   : > { %190 = sfence }
  0x2a   : > { %v898_v0 = vld [vmem:[%s179_s5] sm:$0x3]  ;;  %v900_v1 = vld [vmem:[%s179_s5 + $0x2] sm:$0x3]  ;;  %v902_v2 = vld [vmem:[%s179_s5 + $0x4] sm:$0x3] }
  0x2b   : > { %v904_v3 = vld [vmem:[%s179_s5 + $0x6] sm:$0x3]  ;;  %v214_v4 = vmul.f32 %v898_v0, %v898_v0  ;;  %v215_v5 = vadd.f32 %v900_v1, %v898_v0  ;;  %v216_v6 = vmul.f32 %v900_v1, %v900_v1  ;;  %v219_v7 = vmul.f32 %v902_v2, %v902_v2  ;;  %s918_s18 = sld [smem:[#allocation6 + $0x10]] }
  0x2c   : > { %v222_v10 = vmul.f32 %v904_v3, %v904_v3  ;;  %s920_s20 = sld [smem:[#allocation6]] }
  0x2d   : > { %v217_v8 = vadd.f32 %v216_v6, %v214_v4  ;;  %v218_v9 = vadd.f32 %v902_v2, %v215_v5  ;;  %s922_s26 = sld [smem:[#allocation6 + $0x1]] }
  0x2e   : > { %s924_s27 = sld [smem:[#allocation6 + $0x2]] }
  0x2f   : > { %v220_v11 = vadd.f32 %v219_v7, %v217_v8  ;;  %v221_v12 = vadd.f32 %v904_v3, %v218_v9  ;;  %s926_s29 = sld [smem:[#allocation6 + $0x3]] }
  0x30   : > { %s928_s6 = sld [smem:[#allocation6 + $0x4]] }
  0x31   : > { %v223_v13 = vadd.f32 %v222_v10, %v220_v11  ;;  %v224_v14 = vmul.f32 0.25, %v221_v12  ;;  %s930_s7 = sld [smem:[#allocation6 + $0x8]]  ;;  %v249_v24 = vstv %s918_s18  ;;  %s1043_s18 = sshll.u32 %s884_s4, 3 }
  0x32   : > { %s932_s8 = sld [smem:[#allocation6 + $0xc]]  ;;  %v251_v28 = vstv %s920_s20  ;;  %s206_s20 = scalar_lea.vmem [#allocation7], %s1043_s18 }
  0x33   : > { %v225_v15 = vmul.f32 0.25, %v223_v13  ;;  %v226_v16 = vmul.f32 %v224_v14, %v224_v14  ;;  %s934_s15 = sld [smem:[#allocation6 + $0x11]]  ;;  %v240_v26 = vsub.f32 %v898_v0, %v224_v14  ;;  %v242_v27 = vsub.f32 %v900_v1, %v224_v14 }
  0x34   : > { %s936_s16 = sld [smem:[#allocation6 + $0x5]]  ;;  %v244_v29 = vsub.f32 %v902_v2, %v224_v14  ;;  %v246_v30 = vsub.f32 %v904_v3, %v224_v14  ;;  %v255_v31 = vstv %s922_s26  ;;  %v259_v32 = vstv %s924_s27  ;;  %s386_s26 = sshll.u32 %s206_s20, 4  ;;  %s387_s26 = int_to_ptr.vmem [resolvable:$true] %s386_s26 }
  0x35   : > { %v227_v17 = vsub.f32 %v225_v15, %v226_v16  ;;  %s938_s23 = sld [smem:[#allocation6 + $0x6]]  ;;  %v263_v34 = vstv %s926_s29  ;;  %s372_s27 = scalar_lea.sflag [#allocation4], %s884_s4 }
  0x36   : > { %s940_s24 = sld [smem:[#allocation6 + $0x7]]  ;;  %v281_v35 = vstv %s928_s6 }
  0x37   : > { %v228_v18 = vmax.f32 %v227_v17, 0.0  ;;  %s942_s25 = sld [smem:[#allocation6 + $0x12]]  ;;  %v312_v36 = vstv %s930_s7 }
  0x38   : > { %s944_s30 = sld [smem:[#allocation6 + $0x9]]  ;;  %v343_v37 = vstv %s932_s8 }
  0x39   : > { %v229_v19 = vadd.f32 1e-05, %v228_v18  ;;  %s946_s3 = sld [smem:[#allocation6 + $0xa]]  ;;  %v279_v38 = vstv %s934_s15  ;;  %s695_s15 = scalar_lea.hbm %s1028_s2, 16 }
  0x3a   : > { %s948_s5 = sld [smem:[#allocation6 + $0xb]]  ;;  %v285_v39 = vstv %s936_s16 }
  0x3b   : > { %612 = vrsqrt.f32 %v229_v19  ;;  %s950_s17 = sld [smem:[#allocation6 + $0x13]]  ;;  %vm236_vm0 = vweird.f32 %v229_v19  ;;  %v289_v40 = vstv %s938_s23 }
  0x3c   : > { %s952_s0 = sld [smem:[#allocation6 + $0xd]]  ;;  %v293_v42 = vstv %s940_s24 }
  0x3d   : > { %s954_s1 = sld [smem:[#allocation6 + $0xe]]  ;;  %v310_v43 = vstv %s942_s25 }
  0x3e   : > { %s957_s28 = sld [smem:[#allocation6 + $0xf]]  ;;  %v316_v44 = vstv %s944_s30 }
  0x3f   : > { %v320_v49 = vstv %s946_s3 }
  0x40   : > { %v324_v50 = vstv %s948_s5 }
  0x41   : > { %v613_v20 = vpop.eup %612  ;;  %v341_v51 = vstv %s950_s17 }
  0x42   : > { %v231_v21 = vmul.f32 %v613_v20, %v229_v19  ;;  %vm237_vm1 = vweird.f32 %v613_v20  ;;  %v347_v52 = vstv %s952_s0  ;;  %s534_s0 = sshll.u32 %s753_s12, 3 }
  0x43   : > { %vm238_vm2 = vmor %vm236_vm0, %vm237_vm1  ;;  %v351_v55 = vstv %s954_s1  ;;  %s385_s17 = scalar_lea.hbm %s1028_s2, %s534_s0 }
  0x44   : > { %v232_v22 = vmul.f32 %v613_v20, %v231_v21  ;;  %v355_v56 = vstv %s957_s28  ;;  %s388_s12 = sshll.u32 %s385_s17, 4  ;;  %s389_s12 = int_to_ptr.hbm [resolvable:$true] %s388_s12 }
  0x45   : > { %s689_s29 = sshra.s32 %s389_s12, 4  ;;  %s690_s29 = int_to_ptr.hbm [resolvable:$true] %s689_s29 }
  0x46   : > { %v233_v23 = vmul.f32 0.5, %v232_v22  ;;  %s691_s6 = scalar_lea.hbm %s690_s29, 8  ;;  %p696_p11 = scmp.lt.s32.totalorder %s690_s29, %s1028_s2 }
  0x47   : > { %p692_p3 = scmp.ne.s32.totalorder %s690_s29, %s691_s6  ;;  %p697_p12 = scmp.lt.s32.totalorder %s695_s15, %s691_s6 }
  0x48   : > { %v234_v25 = vsub.f32 1.5, %v233_v23 }
  0x49   : > { %p693_p5 = pnand %p692_p3, %p835_p8  ;;  %p698_p0 = por %p697_p12, %p696_p11 }
  0x4a   : > { %v235_v33 = vmul.f32 %v613_v20, %v234_v25 }
  0x4b   : > { %p694_p7 = pneg %p693_p5 }
  0x4c   : > { %v239_v41 = vsel %vm238_vm2, %v613_v20, %v235_v33 }
  0x4d   : > { %v241_v45 = vmul.f32 %v240_v26, %v239_v41  ;;  %v243_v46 = vmul.f32 %v242_v27, %v239_v41  ;;  %v245_v47 = vmul.f32 %v244_v29, %v239_v41  ;;  %v247_v48 = vmul.f32 %v246_v30, %v239_v41  ;;  %p699_p1 = pnand %p698_p0, %p694_p7 }
  0x4f   : > { %v252_v53 = vmul.f32 %v251_v28, %v241_v45  ;;  %v256_v54 = vmul.f32 %v255_v31, %v243_v46  ;;  %v282_v57 = vmul.f32 %v281_v35, %v241_v45  ;;  %v313_v58 = vmul.f32 %v312_v36, %v241_v45 }
  0x50   : > { %v344_v59 = vmul.f32 %v343_v37, %v241_v45  ;;  %v286_v60 = vmul.f32 %v285_v39, %v243_v46  ;;  %v260_v62 = vmul.f32 %v259_v32, %v245_v47  ;;  %v264_v63 = vmul.f32 %v263_v34, %v247_v48 }
  0x51   : > { %v253_v61 = vadd.f32 %v252_v53, %v249_v24  ;;  %v317_v4 = vmul.f32 %v316_v44, %v243_v46  ;;  %v283_v5 = vadd.f32 %v282_v57, %v279_v38  ;;  %v290_v6 = vmul.f32 %v289_v40, %v245_v47 }
  0x52   : > { %v314_v7 = vadd.f32 %v313_v58, %v310_v43  ;;  %v321_v8 = vmul.f32 %v320_v49, %v245_v47  ;;  %v345_v10 = vadd.f32 %v344_v59, %v341_v51  ;;  %v348_v11 = vmul.f32 %v347_v52, %v243_v46 }
  0x53   : > { %v257_v9 = vadd.f32 %v256_v54, %v253_v61  ;;  %v352_v12 = vmul.f32 %v351_v55, %v245_v47  ;;  %v287_v13 = vadd.f32 %v286_v60, %v283_v5  ;;  %v294_v14 = vmul.f32 %v293_v42, %v247_v48 }
  0x54   : > { %v318_v15 = vadd.f32 %v317_v4, %v314_v7  ;;  %v325_v16 = vmul.f32 %v324_v50, %v247_v48  ;;  %v349_v18 = vadd.f32 %v348_v11, %v345_v10  ;;  %v356_v19 = vmul.f32 %v355_v56, %v247_v48 }
  0x55   : > { %v261_v17 = vadd.f32 %v260_v62, %v257_v9  ;;  %v291_v20 = vadd.f32 %v290_v6, %v287_v13 }
  0x56   : > { %v322_v21 = vadd.f32 %v321_v8, %v318_v15  ;;  %v353_v23 = vadd.f32 %v352_v12, %v349_v18 }
  0x57   : > { %v265_v22 = vadd.f32 %v264_v63, %v261_v17  ;;  %v295_v24 = vadd.f32 %v294_v14, %v291_v20 }
  0x58   : > { %v326_v25 = vadd.f32 %v325_v16, %v322_v21  ;;  %v357_v27 = vadd.f32 %v356_v19, %v353_v23 }
  0x59   : > { %v266_v26 = vmax.f32 %v265_v22, -80.0  ;;  %v296_v28 = vmax.f32 %v295_v24, -80.0 }
  0x5a   : > { %v327_v29 = vmax.f32 %v326_v25, -80.0  ;;  %v358_v31 = vmax.f32 %v357_v27, -80.0 }
  0x5b   : > { %v267_v30 = vsub.f32 0.0, %v266_v26  ;;  %v297_v32 = vsub.f32 0.0, %v296_v28 }
  0x5c   : > { %v328_v33 = vsub.f32 0.0, %v327_v29  ;;  %v359_v35 = vsub.f32 0.0, %v358_v31 }
  0x5d   : > { %v268_v34 = vmul.f32 1.442695, %v267_v30  ;;  %v298_v36 = vmul.f32 1.442695, %v297_v32 }
  0x5e   : > { %v329_v37 = vmul.f32 1.442695, %v328_v33  ;;  %v360_v38 = vmul.f32 1.442695, %v359_v35 }
  0x5f   : > { %614 = vpow2.f32 %v268_v34 }
  0x60   : > { %616 = vpow2.f32 %v298_v36 }
  0x61   : > { %618 = vpow2.f32 %v329_v37 }
  0x62   : > { %620 = vpow2.f32 %v360_v38 }
  0x65   : > { %v615_v39 = vpop.eup %614 }
  0x66   : > { %v617_v40 = vpop.eup %616  ;;  %v270_v41 = vadd.f32 1.0, %v615_v39 }
  0x67   : > { %v619_v42 = vpop.eup %618  ;;  %v300_v43 = vadd.f32 1.0, %v617_v40 }
  0x68   : > { %v621_v44 = vpop.eup %620  ;;  %622 = vrcp.f32 %v270_v41  ;;  %v331_v45 = vadd.f32 1.0, %v619_v42 }
  0x69   : > { %624 = vrcp.f32 %v300_v43  ;;  %v362_v46 = vadd.f32 1.0, %v621_v44 }
  0x6a   : > { %626 = vrcp.f32 %v331_v45 }
  0x6b   : > { %628 = vrcp.f32 %v362_v46 }
  0x6e   : > { %v623_v47 = vpop.eup %622 }
  0x6f   : > { %v625_v48 = vpop.eup %624  ;;  %v272_v49 = vmul.f32 %v623_v47, %v270_v41 }
  0x70   : > { %v627_v50 = vpop.eup %626  ;;  %v302_v51 = vmul.f32 %v625_v48, %v300_v43 }
  0x71   : > { %v629_v52 = vpop.eup %628  ;;  %v273_v53 = vsub.f32 2.0, %v272_v49  ;;  %v333_v54 = vmul.f32 %v627_v50, %v331_v45 }
  0x72   : > { %v303_v55 = vsub.f32 2.0, %v302_v51  ;;  %v364_v56 = vmul.f32 %v629_v52, %v362_v46 }
  0x73   : > { %v274_v57 = vmul.f32 %v623_v47, %v273_v53  ;;  %v334_v58 = vsub.f32 2.0, %v333_v54 }
  0x74   : > { %v304_v59 = vmul.f32 %v625_v48, %v303_v55  ;;  %v365_v60 = vsub.f32 2.0, %v364_v56 }
  0x75   : > { %v275_v61 = vadd.f32 1.0, %v274_v57  ;;  %v335_v62 = vmul.f32 %v627_v50, %v334_v58 }
  0x76   : > { %v305_v63 = vadd.f32 1.0, %v304_v59  ;;  %v366_v4 = vmul.f32 %v629_v52, %v365_v60 }
  0x77   : > { %v276_v5 = vmul.f32 %v275_v61, %v898_v0  ;;  %v336_v6 = vadd.f32 1.0, %v335_v62 }
  0x78   : > { %v306_v7 = vmul.f32 %v900_v1, %v305_v63  ;;  %v367_v8 = vadd.f32 1.0, %v366_v4 }
  0x79   : > { %277 = vst [vmem:[%s206_s20] sm:$0x3] %v276_v5  ;;  %v337_v9 = vmul.f32 %v902_v2, %v336_v6 }
  0x7a   : > { %515 = vst [vmem:[%s206_s20 + $0x2] sm:$0x3] %v306_v7  ;;  %v368_v10 = vmul.f32 %v904_v3, %v367_v8 }
  0x7b   : > { %521 = vst [vmem:[%s206_s20 + $0x4] sm:$0x3] %v337_v9 }
  0x7c   : > { %527 = vst [vmem:[%s206_s20 + $0x6] sm:$0x3] %v368_v10 }
  0x7d   : > { %702 = shalt.err (!%p699_p1)
}
  0x7e   : > { %s766_s4 = smov 32   ;;  %s767_s24 = smov 2  }
  0x7f   : > { %541 = dma.vmem_to_hbm [thread:$0]  (%p835_p8), %s387_s26, 128, %s389_s12, %s372_s27, %s766_s4, %s766_s4, %s767_s24  }
  0x80 PF: > { %s403_s25 = sand.u32 1, %s741_s9   ;;  %p552_p2 = pnand %p495_p13, %p839_p9 }
  0x81   : > { %s404_s30 = scalar_lea.sflag [#allocation4], %s403_s25 }
  0x82   : > { %p553_p4 = pneg %p552_p2 }
  0x84   : > { %736 = dma.done.wait (%p553_p4), %s404_s30, 128  }
  0x85   : > { %738 = vsyncadd (%p553_p4), %s404_s30, 4294967168  ;;  %s19_s14 = sadd.s32 1, %s761_s14   ;;  %s1044_s21 = sld [smem:[#allocation11_spill]] }
  0x86   : > { %p16_p6 = scmp.ge.s32.totalorder %s19_s14, 4   ;;  %s1045_s9 = smov %s745_s10 }
  0x87   : > { %s1046_s10 = smov %s749_s11  ;;  %s1047_s11 = smov %s877_s19 }
  0x88   : > { %s1048_s12 = smov %s757_s13  ;;  %18 = sbr.rel (!%p16_p6) target bundleno = 10 (0xa), region = 84 }
  0x8b   : > { %s1049_s13 = smov %s1044_s21 }
  0x8d   :  { %410 = vsyncpa [#allocation3], 1 }
  0x8e   :  { %412 = vsyncpa [#allocation3 + $0x1], 1 }
  0x8f   :  { %413 = vsyncpa [#allocation4], 1 }
  0x90   :  { %415 = vsyncpa [#allocation4 + $0x1], 1 }
  0x91   :  { %416 = vsyncpa [#allocation5], 1 }
  0x92   :  { %418 = vsyncpa [#allocation5 + $0x1], 1 }

</bundles_post_ra>
